<compile_context>
chip_gen: v5e
topology: v5e:2x2
jax: 0.10.0
libtpu: 0.0.40
codegen_flags: <defaults>
</compile_context>

<pallas_src>
import functools

import jax
import jax.numpy as jnp
from jax.experimental import pallas as pl
from jax.experimental.pallas import tpu as pltpu


def _round_up(x, m):
    return (x + m - 1) // m * m


def _policy_kernel(x_ref, w1_ref, b1_ref, w2_ref, b2_ref, wh_ref, bh_ref, out_ref, *, half):
    cdt = w1_ref.dtype                       # matmul operand dtype (bf16 default, or f32)

    x = x_ref[...].astype(cdt)

    # fc1 + relu (bias / elementwise in f32).  K = input_dim (8); Mosaic masks the sub-tile.
    h = jnp.dot(x, w1_ref[...], preferred_element_type=jnp.float32) + b1_ref[...]
    h = jnp.maximum(h, 0.0)

    # fc2 + relu applied twice with shared weights; load w2/b2 once.
    w2 = w2_ref[...]
    b2 = b2_ref[...]
    h = jnp.maximum(jnp.dot(h.astype(cdt), w2, preferred_element_type=jnp.float32) + b2, 0.0)
    h = jnp.maximum(jnp.dot(h.astype(cdt), w2, preferred_element_type=jnp.float32) + b2, 0.0)

    # Single fused mu|sigma head: mu in lanes [0, half), sigma in [half, 2*half).
    z = jnp.dot(h.astype(cdt), wh_ref[...], preferred_element_type=jnp.float32) + bh_ref[...]

    lane = jax.lax.broadcasted_iota(jnp.int32, z.shape, dimension=1)
    mu = jnp.tanh(z)                                                     # EUP tanh
    sg = jnp.maximum(z, 0.0) + jnp.log1p(jnp.exp(-jnp.abs(z)))           # stable softplus
    out_ref[...] = jnp.where(lane < half, mu, sg)                        # free VPU select


def prepare_params(params, compute_dtype=jnp.bfloat16):
    """One-time prep: transpose PyTorch (out,in) weights and fuse the mu/sigma heads.

    compute_dtype applies only to matmul operands (weights); biases stay f32.
    """
    w1 = params["w1"]                        # (hidden, input_dim)
    hidden, input_dim = w1.shape
    n_actions = params["w_mu"].shape[0]

    # Pack both heads into one lane-dense output: mu | sigma, each `half` lanes wide.
    half = 64 if n_actions <= 64 else _round_up(n_actions, 128)
    total = 2 * half

    wh = jnp.zeros((hidden, total), jnp.float32)
    wh = wh.at[:, :n_actions].set(params["w_mu"].T)
    wh = wh.at[:, half:half + n_actions].set(params["w_sg"].T)
    bh = jnp.zeros((1, total), jnp.float32)
    bh = bh.at[0, :n_actions].set(params["b_mu"])
    bh = bh.at[0, half:half + n_actions].set(params["b_sg"])

    return {
        "w1": w1.T.astype(compute_dtype),                       # (input_dim, hidden), no pad
        "b1": params["b1"][None, :].astype(jnp.float32),
        "w2": params["w2"].T.astype(compute_dtype),
        "b2": params["b2"][None, :].astype(jnp.float32),
        "wh": wh.astype(compute_dtype),
        "bh": bh,
        "input_dim": int(input_dim),
        "hidden": int(hidden),
        "n_actions": int(n_actions),
        "half": int(half),
    }


def policy_forward(state, prep, *, block_b=512):
    """state: (B, input_dim) f32. prep: output of prepare_params. Returns (mu, sigma)."""
    B, input_dim = state.shape
    assert input_dim == prep["input_dim"]
    hidden, half, n_actions = prep["hidden"], prep["half"], prep["n_actions"]
    total = 2 * half

    # 1-D batch grid: grid of 1 at small B, blocks of `block_b` rows at rollout scale.
    bb = B if B <= block_b else block_b
    grid = (pl.cdiv(B, bb),)

    row_map = lambda i: (i, 0)
    const_map = lambda i: (0, 0)          # weights stay VMEM-resident across grid steps

    out = pl.pallas_call(
        functools.partial(_policy_kernel, half=half),
        out_shape=jax.ShapeDtypeStruct((B, total), jnp.float32),
        grid=grid,
        in_specs=[
            pl.BlockSpec((bb, input_dim), row_map),
            pl.BlockSpec((input_dim, hidden), const_map),
            pl.BlockSpec((1, hidden), const_map),
            pl.BlockSpec((hidden, hidden), const_map),
            pl.BlockSpec((1, hidden), const_map),
            pl.BlockSpec((hidden, total), const_map),
            pl.BlockSpec((1, total), const_map),
        ],
        out_specs=pl.BlockSpec((bb, total), row_map),
        compiler_params=pltpu.CompilerParams(dimension_semantics=("parallel",)),
    )(state, prep["w1"], prep["b1"], prep["w2"], prep["b2"], prep["wh"], prep["bh"])

    return out[:, :n_actions], out[:, half:half + n_actions]


def init_params(key, input_dim, n_actions, hidden=128):
    """Deterministic init mirroring nn.Linear default (U(-1/sqrt(fan_in), 1/sqrt(fan_in)))."""
    def linear_init(k, fan_in, fan_out):
        kw, kb = jax.random.split(k)
        bound = 1.0 / jnp.sqrt(fan_in)
        w = jax.random.uniform(kw, (fan_out, fan_in), jnp.float32, -bound, bound)
        b = jax.random.uniform(kb, (fan_out,), jnp.float32, -bound, bound)
        return w, b

    k1, k2, k3, k4 = jax.random.split(key, 4)
    w1, b1 = linear_init(k1, input_dim, hidden)
    w2, b2 = linear_init(k2, hidden, hidden)
    w_mu, b_mu = linear_init(k3, hidden, n_actions)
    w_sg, b_sg = linear_init(k4, hidden, n_actions)
    return {"w1": w1, "b1": b1, "w2": w2, "b2": b2,
            "w_mu": w_mu, "b_mu": b_mu, "w_sg": w_sg, "b_sg": b_sg}


def _reference(state, p):
    h = jax.nn.relu(state @ p["w1"].T + p["b1"])
    h = jax.nn.relu(h @ p["w2"].T + p["b2"])
    h = jax.nn.relu(h @ p["w2"].T + p["b2"])
    mu = jnp.tanh(h @ p["w_mu"].T + p["b_mu"])
    sigma = jax.nn.softplus(h @ p["w_sg"].T + p["b_sg"])
    return mu, sigma


if __name__ == "__main__":
    key = jax.random.PRNGKey(0)
    k_param, k_state = jax.random.split(key)

    # LunarLanderContinuous-v2: observation dim 8, action dim 2.
    batch, input_dim, n_actions = 4, 8, 2
    params = init_params(k_param, input_dim, n_actions)
    state = jax.random.normal(k_state, (batch, input_dim), jnp.float32)
    mu_ref, sg_ref = _reference(state, params)

    # f32 matmul operands: exactness check (tiny batch, unpadded input, packed head).
    prep_f32 = prepare_params(params, compute_dtype=jnp.float32)
    mu, sg = policy_forward(state, prep_f32)
    jax.block_until_ready((mu, sg))
    assert mu.shape == (batch, n_actions) and sg.shape == (batch, n_actions)
    assert jnp.allclose(mu, mu_ref, atol=1e-5), "mu mismatch (f32)"
    assert jnp.allclose(sg, sg_ref, atol=1e-5), "sigma mismatch (f32)"

    # Default path: bf16 MXU operands, f32 accumulate + f32 bias/relu/tanh/softplus.
    prep = prepare_params(params)
    mu_h, sg_h = policy_forward(state, prep)
    jax.block_until_ready((mu_h, sg_h))
    assert jnp.allclose(mu_h, mu_ref, atol=0.1), "mu mismatch (bf16)"
    assert jnp.allclose(sg_h, sg_ref, atol=0.1), "sigma mismatch (bf16)"

    # Rollout-scale batch: exercises the parallel batch grid (3 blocks of 512 rows).
    state_big = jax.random.normal(jax.random.PRNGKey(1), (1536, input_dim), jnp.float32)
    mu_b, sg_b = policy_forward(state_big, prep_f32)
    jax.block_until_ready((mu_b, sg_b))
    mu_br, sg_br = _reference(state_big, params)
    assert jnp.allclose(mu_b, mu_br, atol=1e-5), "mu mismatch (big batch)"
    assert jnp.allclose(sg_b, sg_br, atol=1e-5), "sigma mismatch (big batch)"

    print("KERNEL_OK")
</pallas_src>

<mosaic_0001>
module attributes {stable_mosaic.version = 11 : i64} {
  func.func @_policy_kernel(%arg0: i32, %arg1: memref<4x8xf32, #tpu.memory_space<vmem>>, %arg2: memref<8x128xf32, #tpu.memory_space<vmem>>, %arg3: memref<1x128xf32, #tpu.memory_space<vmem>>, %arg4: memref<128x128xf32, #tpu.memory_space<vmem>>, %arg5: memref<1x128xf32, #tpu.memory_space<vmem>>, %arg6: memref<128x128xf32, #tpu.memory_space<vmem>>, %arg7: memref<1x128xf32, #tpu.memory_space<vmem>>, %arg8: memref<4x128xf32, #tpu.memory_space<vmem>>) attributes {dimension_semantics = [#tpu.dimension_semantics<parallel>], iteration_bounds = array<i64: 1>, scalar_prefetch = 0 : i64, scratch_operands = 0 : i64, tpu.core_type = #tpu.core_type<tc>, window_params = [{transform_indices = @transform_0, window_bounds = array<i64: 4, 8>}, {pipeline_mode = #tpu.pipeline_mode<synchronous>, transform_indices = @transform_1, window_bounds = array<i64: 8, 128>}, {pipeline_mode = #tpu.pipeline_mode<synchronous>, transform_indices = @transform_2, window_bounds = array<i64: 1, 128>}, {pipeline_mode = #tpu.pipeline_mode<synchronous>, transform_indices = @transform_3, window_bounds = array<i64: 128, 128>}, {pipeline_mode = #tpu.pipeline_mode<synchronous>, transform_indices = @transform_4, window_bounds = array<i64: 1, 128>}, {pipeline_mode = #tpu.pipeline_mode<synchronous>, transform_indices = @transform_5, window_bounds = array<i64: 128, 128>}, {pipeline_mode = #tpu.pipeline_mode<synchronous>, transform_indices = @transform_6, window_bounds = array<i64: 1, 128>}, {transform_indices = @transform_7, window_bounds = array<i64: 4, 128>}]} {
    %c0 = arith.constant 0 : index
    %c0_0 = arith.constant 0 : index
    %0 = vector.load %arg1[%c0, %c0_0] : memref<4x8xf32, #tpu.memory_space<vmem>>, vector<4x8xf32>
    %c0_1 = arith.constant 0 : index
    %c0_2 = arith.constant 0 : index
    %1 = vector.load %arg2[%c0_1, %c0_2] : memref<8x128xf32, #tpu.memory_space<vmem>>, vector<8x128xf32>
    %cst = arith.constant dense<0.000000e+00> : vector<4x128xf32>
    %2 = tpu.matmul %0, %1, %cst {dimension_numbers = #tpu.dot_dimension_numbers<[1], [0], [0], [1], [0, 0, 1, 1], [], []>} : vector<4x8xf32>, vector<8x128xf32>, vector<4x128xf32> -> vector<4x128xf32>
    %c0_3 = arith.constant 0 : index
    %c0_4 = arith.constant 0 : index
    %3 = vector.load %arg3[%c0_3, %c0_4] : memref<1x128xf32, #tpu.memory_space<vmem>>, vector<1x128xf32>
    %4 = vector.broadcast %3 : vector<1x128xf32> to vector<4x128xf32>
    %5 = arith.addf %2, %4 : vector<4x128xf32>
    %cst_5 = arith.constant 0.000000e+00 : f32
    %6 = vector.broadcast %cst_5 : f32 to vector<4x128xf32>
    %7 = arith.maximumf %5, %6 : vector<4x128xf32>
    %c0_6 = arith.constant 0 : index
    %c0_7 = arith.constant 0 : index
    %8 = vector.load %arg4[%c0_6, %c0_7] : memref<128x128xf32, #tpu.memory_space<vmem>>, vector<128x128xf32>
    %c0_8 = arith.constant 0 : index
    %c0_9 = arith.constant 0 : index
    %9 = vector.load %arg5[%c0_8, %c0_9] : memref<1x128xf32, #tpu.memory_space<vmem>>, vector<1x128xf32>
    %cst_10 = arith.constant dense<0.000000e+00> : vector<4x128xf32>
    %10 = tpu.matmul %7, %8, %cst_10 {dimension_numbers = #tpu.dot_dimension_numbers<[1], [0], [0], [1], [0, 0, 1, 1], [], []>} : vector<4x128xf32>, vector<128x128xf32>, vector<4x128xf32> -> vector<4x128xf32>
    %11 = vector.broadcast %9 : vector<1x128xf32> to vector<4x128xf32>
    %12 = arith.addf %10, %11 : vector<4x128xf32>
    %cst_11 = arith.constant 0.000000e+00 : f32
    %13 = vector.broadcast %cst_11 : f32 to vector<4x128xf32>
    %14 = arith.maximumf %12, %13 : vector<4x128xf32>
    %cst_12 = arith.constant dense<0.000000e+00> : vector<4x128xf32>
    %15 = tpu.matmul %14, %8, %cst_12 {dimension_numbers = #tpu.dot_dimension_numbers<[1], [0], [0], [1], [0, 0, 1, 1], [], []>} : vector<4x128xf32>, vector<128x128xf32>, vector<4x128xf32> -> vector<4x128xf32>
    %16 = vector.broadcast %9 : vector<1x128xf32> to vector<4x128xf32>
    %17 = arith.addf %15, %16 : vector<4x128xf32>
    %cst_13 = arith.constant 0.000000e+00 : f32
    %18 = vector.broadcast %cst_13 : f32 to vector<4x128xf32>
    %19 = arith.maximumf %17, %18 : vector<4x128xf32>
    %c0_14 = arith.constant 0 : index
    %c0_15 = arith.constant 0 : index
    %20 = vector.load %arg6[%c0_14, %c0_15] : memref<128x128xf32, #tpu.memory_space<vmem>>, vector<128x128xf32>
    %cst_16 = arith.constant dense<0.000000e+00> : vector<4x128xf32>
    %21 = tpu.matmul %19, %20, %cst_16 {dimension_numbers = #tpu.dot_dimension_numbers<[1], [0], [0], [1], [0, 0, 1, 1], [], []>} : vector<4x128xf32>, vector<128x128xf32>, vector<4x128xf32> -> vector<4x128xf32>
    %c0_17 = arith.constant 0 : index
    %c0_18 = arith.constant 0 : index
    %22 = vector.load %arg7[%c0_17, %c0_18] : memref<1x128xf32, #tpu.memory_space<vmem>>, vector<1x128xf32>
    %23 = vector.broadcast %22 : vector<1x128xf32> to vector<4x128xf32>
    %24 = arith.addf %21, %23 : vector<4x128xf32>
    %25 = tpu.iota {dimensions = array<i32: 1>} : vector<4x128xi32>
    %26 = math.tanh %24 : vector<4x128xf32>
    %cst_19 = arith.constant 0.000000e+00 : f32
    %27 = vector.broadcast %cst_19 : f32 to vector<4x128xf32>
    %28 = arith.maximumf %24, %27 : vector<4x128xf32>
    %29 = math.absf %24 : vector<4x128xf32>
    %cst_20 = arith.constant 0.000000e+00 : f32
    %30 = vector.broadcast %cst_20 : f32 to vector<4x128xf32>
    %31 = arith.subf %30, %29 : vector<4x128xf32>
    %32 = math.exp %31 : vector<4x128xf32>
    %33 = math.log1p %32 : vector<4x128xf32>
    %34 = arith.addf %28, %33 : vector<4x128xf32>
    %c64_i32 = arith.constant 64 : i32
    %35 = vector.broadcast %c64_i32 : i32 to vector<4x128xi32>
    %36 = arith.cmpi slt, %25, %35 : vector<4x128xi32>
    %37 = arith.select %36, %26, %34 : vector<4x128xi1>, vector<4x128xf32>
    %c0_21 = arith.constant 0 : index
    %c0_22 = arith.constant 0 : index
    %38 = vector.load %arg8[%c0_21, %c0_22] : memref<4x128xf32, #tpu.memory_space<vmem>>, vector<4x128xf32>
    tpu.vector_store %arg8[%c0_21, %c0_22], %37 {strides = array<i32>} : memref<4x128xf32, #tpu.memory_space<vmem>>, vector<4x128xf32>,
    return
  }
  func.func @transform_0(%arg0: i32) -> (i32, i32) {
    %c0_i32 = arith.constant 0 : i32
    %c0_i32_0 = arith.constant 0 : i32
    return %arg0, %c0_i32 : i32, i32
  }
  func.func @transform_1(%arg0: i32) -> (i32, i32) {
    %c0_i32 = arith.constant 0 : i32
    %c0_i32_0 = arith.constant 0 : i32
    %c0_i32_1 = arith.constant 0 : i32
    return %c0_i32, %c0_i32_0 : i32, i32
  }
  func.func @transform_2(%arg0: i32) -> (i32, i32) {
    %c0_i32 = arith.constant 0 : i32
    %c0_i32_0 = arith.constant 0 : i32
    %c0_i32_1 = arith.constant 0 : i32
    return %c0_i32, %c0_i32_0 : i32, i32
  }
  func.func @transform_3(%arg0: i32) -> (i32, i32) {
    %c0_i32 = arith.constant 0 : i32
    %c0_i32_0 = arith.constant 0 : i32
    %c0_i32_1 = arith.constant 0 : i32
    return %c0_i32, %c0_i32_0 : i32, i32
  }
  func.func @transform_4(%arg0: i32) -> (i32, i32) {
    %c0_i32 = arith.constant 0 : i32
    %c0_i32_0 = arith.constant 0 : i32
    %c0_i32_1 = arith.constant 0 : i32
    return %c0_i32, %c0_i32_0 : i32, i32
  }
  func.func @transform_5(%arg0: i32) -> (i32, i32) {
    %c0_i32 = arith.constant 0 : i32
    %c0_i32_0 = arith.constant 0 : i32
    %c0_i32_1 = arith.constant 0 : i32
    return %c0_i32, %c0_i32_0 : i32, i32
  }
  func.func @transform_6(%arg0: i32) -> (i32, i32) {
    %c0_i32 = arith.constant 0 : i32
    %c0_i32_0 = arith.constant 0 : i32
    %c0_i32_1 = arith.constant 0 : i32
    return %c0_i32, %c0_i32_0 : i32, i32
  }
  func.func @transform_7(%arg0: i32) -> (i32, i32) {
    %c0_i32 = arith.constant 0 : i32
    %c0_i32_0 = arith.constant 0 : i32
    return %arg0, %c0_i32 : i32, i32
  }
}

</mosaic_0001>

<bundles_post_ra>
// kernel: tpu_custom_call.1
= control target key start
LH: loop header
LB: loop body
LE: loop exit
PB: predicated region body
PF: predicated region fallthrough
CT: control target
= control target key end

     0   :  { %12 = vsyncpa [#allocation3], 0  ;;  %s475_s0 = inlined_call_operand.hbm [shape: f32[4,8], index: 0, kind: input, shape index: {}]   ;;  %s476_s1 = inlined_call_operand.hbm [shape: f32[8,128], index: 1, kind: input, shape index: {}]   ;;  %s477_s2 = inlined_call_operand.vmem [shape: f32[1,128], index: 2, kind: input, shape index: {}]   ;;  %s478_s3 = inlined_call_operand.hbm [shape: f32[128,128], index: 3, kind: input, shape index: {}]   ;;  %s479_s4 = inlined_call_operand.vmem [shape: f32[1,128], index: 4, kind: input, shape index: {}]   ;;  %s480_s5 = inlined_call_operand.hbm [shape: f32[128,128], index: 5, kind: input, shape index: {}]   ;;  %s481_s6 = inlined_call_operand.vmem [shape: f32[1,128], index: 6, kind: input, shape index: {}]   ;;  %s482_s7 = inlined_call_operand.hbm [shape: f32[4,128], index: 7, kind: output, shape index: {}]  }
   0x1   :  { %13 = vsyncpa [#allocation6], 0 }
   0x2   :  { %14 = vsyncpa [#allocation9], 0  ;;  %s32_s26 = sshll.u32 %s476_s1, 4  ;;  %s33_s26 = int_to_ptr.hbm [resolvable:$true] %s32_s26 }
   0x3   :  { %15 = vsyncpa [#allocation4], 0  ;;  %s404_s27 = smov [#allocation5]   ;;  %s21_s8 = sshll.u32 %s475_s0, 4  ;;  %s22_s8 = int_to_ptr.hbm [resolvable:$true] %s21_s8 }
   0x4   :  { %s34_s28 = sshll.u32 %s404_s27, 4  ;;  %s405_s9 = smov [#allocation2]   ;;  %s35_s28 = int_to_ptr.vmem [resolvable:$true] %s34_s28 }
   0x5   :  { %37 = dma.hbm_to_vmem [thread:$0]  %s33_s26, 128, %s35_s28, [#allocation6]  }
   0x6   :  { %s23_s10 = sshll.u32 %s405_s9, 4  ;;  %s44_s13 = sshll.u32 %s478_s3, 4  ;;  %s24_s10 = int_to_ptr.vmem [resolvable:$true] %s23_s10  ;;  %s45_s13 = int_to_ptr.hbm [resolvable:$true] %s44_s13 }
   0x7   :  { %26 = dma.hbm_to_vmem [thread:$0]  %s22_s8, 64, %s24_s10, [#allocation3]  }
   0x8   :  { %s406_s1 = smov [#allocation7]   ;;  %s59_s17 = sshll.u32 %s480_s5, 4  ;;  %s60_s17 = int_to_ptr.hbm [resolvable:$true] %s59_s17 }
   0x9   :  { %s46_s14 = sshll.u32 %s406_s1, 4  ;;  %s407_s18 = smov 128   ;;  %s47_s14 = int_to_ptr.vmem [resolvable:$true] %s46_s14 }
   0xa   :  { %s408_s0 = smov 8   ;;  %s409_s19 = smov [#allocation8]  }
   0xb   :  { %52 = dma.hbm_to_vmem [thread:$0]  %s45_s13, 2048, %s47_s14, [#allocation6], %s407_s18, %s407_s18, %s408_s0  }
   0xc   :  { %s61_s20 = sshll.u32 %s409_s19, 4  ;;  %s62_s20 = int_to_ptr.vmem [resolvable:$true] %s61_s20 }
   0xd   :  { %67 = dma.hbm_to_vmem [thread:$0]  %s60_s17, 2048, %s62_s20, [#allocation9], %s407_s18, %s407_s18, %s408_s0  }
   0xe   :  { %396 = dma.done.wait [#allocation3], 64  }
   0xf   :  { %397 = vsyncadd [#allocation3], 4294967232 }
  0x10   :  { %398 = dma.done.wait [#allocation6], 2176  }
  0x11   :  { %399 = vsyncadd [#allocation6], 4294965120 }
  0x12   :  { %400 = dma.done.wait [#allocation9], 2048  }
  0x13   :  { %401 = vsyncadd [#allocation9], 4294965248  ;;  %vm92_vm0 = vcmask 64512   ;;  %v87_v0 = vld [vmem:[#allocation5] sm:$0xff]  ;;  %v86_v1 = vld [vmem:[#allocation2] sm:$0xf]  ;;  %v219_v54 = vlaneseq }
  0x14   :  { %v132_v2 = vld [vmem:[#allocation7 + $0x78] sm:$0xff]  ;;  %111 = vmatpush.msra.mxu0 %v87_v0  ;;  %v131_v3 = vld [vmem:[#allocation7 + $0x70] sm:$0xff]  ;;  %v130_v4 = vld [vmem:[#allocation7 + $0x68] sm:$0xff]  ;;  %s247_s26 = sshll.u32 %s482_s7, 4  ;;  %s248_s26 = int_to_ptr.hbm [resolvable:$true] %s247_s26 }
  0x15   :  { %137 = vmatpush.msra.mxu1 %v132_v2  ;;  %259 = vmatmul.msk.f32.vlgmr.msra.gmra.mxu0 %vm92_vm0, %v86_v1  ;;  %v129_v5 = vld [vmem:[#allocation7 + $0x60] sm:$0xff]  ;;  %v128_v6 = vld [vmem:[#allocation7 + $0x58] sm:$0xff]  ;;  %v127_v7 = vld [vmem:[#allocation7 + $0x50] sm:$0xff]  ;;  %v220_v57 = vand.u32 127, %v219_v54 }
  0x16   :  { %158 = vmatpush.msra.mxu2 %v132_v2  ;;  %v126_v8 = vld [vmem:[#allocation7 + $0x48] sm:$0xff]  ;;  %v125_v9 = vld [vmem:[#allocation7 + $0x40] sm:$0xff]  ;;  %v124_v10 = vld [vmem:[#allocation7 + $0x38] sm:$0xff] }
  0x17   :  { %138 = vmatpush.msra.mxu1 %v131_v3  ;;  %v123_v11 = vld [vmem:[#allocation7 + $0x30] sm:$0xff]  ;;  %v122_v12 = vld [vmem:[#allocation7 + $0x28] sm:$0xff]  ;;  %v121_v13 = vld [vmem:[#allocation7 + $0x20] sm:$0xff]  ;;  %vm237_vm2 = vcmp.lt.s32.totalorder %v220_v57, 64 }
  0x18   :  { %159 = vmatpush.msra.mxu2 %v131_v3  ;;  %v120_v14 = vld [vmem:[#allocation7 + $0x18] sm:$0xff]  ;;  %v119_v15 = vld [vmem:[#allocation7 + $0x10] sm:$0xff]  ;;  %v118_v16 = vld [vmem:[#allocation7 + $0x8] sm:$0xff] }
  0x19   :  { %139 = vmatpush.msra.mxu1 %v130_v4  ;;  %v117_v17 = vld [vmem:[#allocation7] sm:$0xff]  ;;  %v267_v18 = vld [vmem:[%s477_s2] ss:$0 sm:$0xff]  ;;  %v194_v22 = vld [vmem:[#allocation8 + $0x78] sm:$0xff] }
  0x1a   :  { %160 = vmatpush.msra.mxu2 %v130_v4  ;;  %v193_v23 = vld [vmem:[#allocation8 + $0x70] sm:$0xff]  ;;  %199 = vmatpush.msra.mxu3 %v194_v22  ;;  %v192_v24 = vld [vmem:[#allocation8 + $0x68] sm:$0xff]  ;;  %v191_v25 = vld [vmem:[#allocation8 + $0x60] sm:$0xff] }
  0x1b   :  { %140 = vmatpush.msra.mxu1 %v129_v5  ;;  %v190_v26 = vld [vmem:[#allocation8 + $0x58] sm:$0xff]  ;;  %v189_v27 = vld [vmem:[#allocation8 + $0x50] sm:$0xff]  ;;  %v188_v28 = vld [vmem:[#allocation8 + $0x48] sm:$0xff] }
  0x1c   :  { %161 = vmatpush.msra.mxu2 %v129_v5  ;;  %200 = vmatpush.msra.mxu3 %v193_v23  ;;  %v187_v29 = vld [vmem:[#allocation8 + $0x40] sm:$0xff]  ;;  %v186_v30 = vld [vmem:[#allocation8 + $0x38] sm:$0xff]  ;;  %v185_v31 = vld [vmem:[#allocation8 + $0x30] sm:$0xff] }
  0x1d   :  { %141 = vmatpush.msra.mxu1 %v128_v6  ;;  %v184_v32 = vld [vmem:[#allocation8 + $0x28] sm:$0xff]  ;;  %v183_v33 = vld [vmem:[#allocation8 + $0x20] sm:$0xff]  ;;  %v182_v34 = vld [vmem:[#allocation8 + $0x18] sm:$0xff] }
  0x1e   :  { %162 = vmatpush.msra.mxu2 %v128_v6  ;;  %201 = vmatpush.msra.mxu3 %v192_v24  ;;  %v268_v35 = vld [vmem:[%s479_s4] ss:$0 sm:$0xff]  ;;  %v180_v40 = vld [vmem:[#allocation8 + $0x8] sm:$0xff]  ;;  %v179_v41 = vld [vmem:[#allocation8] sm:$0xff]  ;;  %s410_s4 = smov [#allocation10]  }
  0x1f   :  { %142 = vmatpush.msra.mxu1 %v127_v7  ;;  %v181_v39 = vld [vmem:[#allocation8 + $0x10] sm:$0xff] }
  0x20   :  { %163 = vmatpush.msra.mxu2 %v127_v7  ;;  %202 = vmatpush.msra.mxu3 %v191_v25  ;;  %v269_v45 = vld [vmem:[%s481_s6] ss:$0 sm:$0xff]  ;;  %s245_s6 = sshll.u32 %s410_s4, 4  ;;  %s246_s6 = int_to_ptr.vmem [resolvable:$true] %s245_s6 }
  0x21   :  { %143 = vmatpush.msra.mxu1 %v126_v8 }
  0x22   :  { %164 = vmatpush.msra.mxu2 %v126_v8  ;;  %203 = vmatpush.msra.mxu3 %v190_v26 }
  0x23   :  { %144 = vmatpush.msra.mxu1 %v125_v9 }
  0x24   :  { %165 = vmatpush.msra.mxu2 %v125_v9  ;;  %204 = vmatpush.msra.mxu3 %v189_v27 }
  0x25   :  { %145 = vmatpush.msra.mxu1 %v124_v10 }
  0x26   :  { %166 = vmatpush.msra.mxu2 %v124_v10  ;;  %205 = vmatpush.msra.mxu3 %v188_v28 }
  0x27   :  { %146 = vmatpush.msra.mxu1 %v123_v11 }
  0x28   :  { %167 = vmatpush.msra.mxu2 %v123_v11  ;;  %206 = vmatpush.msra.mxu3 %v187_v29 }
  0x29   :  { %147 = vmatpush.msra.mxu1 %v122_v12 }
  0x2a   :  { %168 = vmatpush.msra.mxu2 %v122_v12  ;;  %207 = vmatpush.msra.mxu3 %v186_v30 }
  0x2b   :  { %148 = vmatpush.msra.mxu1 %v121_v13 }
  0x2c   :  { %169 = vmatpush.msra.mxu2 %v121_v13  ;;  %208 = vmatpush.msra.mxu3 %v185_v31 }
  0x2d   :  { %149 = vmatpush.msra.mxu1 %v120_v14 }
  0x2e   :  { %170 = vmatpush.msra.mxu2 %v120_v14  ;;  %209 = vmatpush.msra.mxu3 %v184_v32 }
  0x2f   :  { %150 = vmatpush.msra.mxu1 %v119_v15 }
  0x30   :  { %171 = vmatpush.msra.mxu2 %v119_v15  ;;  %210 = vmatpush.msra.mxu3 %v183_v33 }
  0x31   :  { %151 = vmatpush.msra.mxu1 %v118_v16 }
  0x32   :  { %172 = vmatpush.msra.mxu2 %v118_v16  ;;  %211 = vmatpush.msra.mxu3 %v182_v34 }
  0x33   :  { %152 = vmatpush.msra.mxu1 %v117_v17 }
  0x34   :  { %173 = vmatpush.msra.mxu2 %v117_v17  ;;  %212 = vmatpush.msra.mxu3 %v181_v39 }
  0x36   :  { %213 = vmatpush.msra.mxu3 %v180_v40 }
  0x38   :  { %214 = vmatpush.msra.mxu3 %v179_v41 }
  0x92   :  { %v113_v19 = vpop.f32.mrf.mxu0 }
  0x93   :  { %v114_v20 = vadd.f32 %v267_v18, %v113_v19 }
  0x95   :  { %v116_v21 = vmax.f32 %v114_v20, 0.0 }
  0x97   :  { %153 = vmatmul.f32.vlgmr.msra.gmra.mxu1 %v116_v21 }
 0x114   :  { %v154_v36 = vpop.f32.mrf.mxu1 }
 0x115   :  { %v155_v37 = vadd.f32 %v268_v35, %v154_v36 }
 0x117   :  { %v157_v38 = vmax.f32 %v155_v37, 0.0 }
 0x119   :  { %174 = vmatmul.f32.vlgmr.msra.gmra.mxu2 %v157_v38 }
 0x19c   :  { %v175_v42 = vpop.f32.mrf.mxu2 }
 0x19d   :  { %v176_v43 = vadd.f32 %v268_v35, %v175_v42 }
 0x19f   :  { %v178_v44 = vmax.f32 %v176_v43, 0.0 }
 0x1a1   :  { %215 = vmatmul.f32.vlgmr.msra.gmra.mxu3 %v178_v44 }
 0x224   :  { %v216_v46 = vpop.f32.mrf.mxu3 }
 0x225   :  { %v217_v47 = vadd.f32 %v269_v45, %v216_v46 }
 0x227   :  { %v223_v48 = vand.u32 2147483647, %v217_v47  ;;  %v222_v61 = vmax.f32 %v217_v47, 0.0 }
 0x229   :  { %v224_v49 = vsub.f32 0.0, %v223_v48 }
 0x22b   :  { %v225_v50 = vmul.f32 1.442695, %v224_v49 }
 0x22d   :  { %270 = vpow2.f32 %v225_v50 }
 0x233   :  { %v271_v51 = vpop.eup %270 }
 0x234   :  { %v227_v52 = vadd.f32 1.0, %v271_v51  ;;  %v230_v53 = vmul.f32 -0.5, %v271_v51  ;;  %v233_v56 = vand.u32 2147483647, %v271_v51 }
 0x236   :  { %272 = vlog2.f32 %v227_v52  ;;  %v231_v55 = vadd.f32 1.0, %v230_v53  ;;  %vm234_vm1 = vcmp.lt.f32.partialorder %v233_v56, 0.0004427343 }
 0x237   :  { %274 = vtanh.f32 %v217_v47 }
 0x238   :  { %v232_v60 = vmul.f32 %v271_v51, %v231_v55 }
 0x23c   :  { %v273_v58 = vpop.eup %272 }
 0x23d   :  { %v229_v59 = vmul.f32 0.6931472, %v273_v58  ;;  %v275_v0 = vpop.eup %274 }
 0x23f   :  { %v235_v62 = vsel %vm234_vm1, %v232_v60, %v229_v59 }
 0x240   :  { %v236_v63 = vadd.f32 %v235_v62, %v222_v61 }
 0x242   :  { %v238_v1 = vsel %vm237_vm2, %v275_v0, %v236_v63 }
 0x243   :  { %239 = vst [vmem:[#allocation10] sm:$0xf] %v238_v1 }
 0x244   :  { %250 = dma.vmem_to_hbm [thread:$0]  %s246_s6, 64, %s248_s26, [#allocation4]  }
 0x245   :  { %402 = dma.done.wait [#allocation4], 64  }
 0x246   :  { %403 = vsyncadd [#allocation4], 4294967232 }
 0x247   :  { %255 = vsyncpa [#allocation3], 1 }
 0x248   :  { %256 = vsyncpa [#allocation6], 1 }
 0x249   :  { %257 = vsyncpa [#allocation9], 1 }
 0x24a   :  { %258 = vsyncpa [#allocation4], 1 }

</bundles_post_ra>
